<compile_context>
chip_gen: v6e
topology: v6e:2x2x1
jax: 0.10.0
libtpu: 0.0.40
codegen_flags: <defaults>
</compile_context>

<pallas_src>
import functools
import math

import jax
import jax.numpy as jnp
from jax.experimental import pallas as pl
from jax.experimental.pallas import tpu as pltpu


# --------------------------------------------------------------------------- #
# Helpers
# --------------------------------------------------------------------------- #
def _llama3_hidden_dim(dim, hidden_dim, multiple_of, ffn_dim_multiplier):
    hidden_dim = int(2 * hidden_dim / 3)
    if ffn_dim_multiplier is not None:
        hidden_dim = int(ffn_dim_multiplier * hidden_dim)
    hidden_dim = multiple_of * ((hidden_dim + multiple_of - 1) // multiple_of)
    return hidden_dim


def _round_up(a, b):
    return ((a + b - 1) // b) * b


def _vmem_capacity_bytes():
    """Per-core VMEM capacity; conservative 64 MiB fallback if the query fails."""
    default = 64 * 2**20
    try:
        info = pltpu.get_tpu_info()
    except Exception:
        return default
    for name in ("vmem_capacity_bytes", "vmem_size_bytes", "vmem_bytes"):
        v = getattr(info, name, None)
        if v:
            return int(v)
    return default


def _plan_tn_h(dim, hidden, *, tm, compute_dtype, out_bytes, vmem_budget,
               weight_buffers):
    """Largest 128-multiple hidden tile whose working set fits the VMEM budget."""
    bpe = jnp.dtype(compute_dtype).itemsize
    # Fixed per-M-tile footprint: double-buffered x and out tiles + f32 accumulator.
    fixed = 2 * tm * dim * bpe + 2 * tm * dim * out_bytes + tm * dim * 4
    # Marginal bytes per hidden unit: weight slices (w13 contributes 2 columns of
    # `dim`, w2 one row of `dim`) times the buffer depth, plus the f32 h13 and
    # compute-dtype gated intermediates.
    per_tn = weight_buffers * 3 * dim * bpe + 2 * tm * 4 + tm * bpe
    usable = vmem_budget - fixed - (2 << 20)          # ~2 MiB slack for Mosaic
    tn_h = (max(usable, 0) // per_tn) // 128 * 128
    tn_h = int(max(128, min(tn_h, _round_up(hidden, 128))))
    return tn_h


def _prepare_weights(w1, w2, w3, *, tn_h, hidden_pad, compute_dtype):
    """One-time weight prep: cast, fuse W1||W3 per hidden tile, relayout, pad."""
    hidden, dim = w1.shape
    pad = hidden_pad - hidden
    w1p = jnp.pad(w1.astype(compute_dtype), ((0, pad), (0, 0)))
    w3p = jnp.pad(w3.astype(compute_dtype), ((0, pad), (0, 0)))
    nh = hidden_pad // tn_h
    # Interleave per-tn_h slices so each (dim, 2*tn_h) block is [W1 slice | W3 slice].
    w13 = jnp.concatenate(
        [w1p.reshape(nh, tn_h, dim), w3p.reshape(nh, tn_h, dim)], axis=1
    ).reshape(2 * hidden_pad, dim)
    w13 = jnp.asarray(w13.T)                                   # (dim, 2*hidden_pad)
    w2p = jnp.pad(w2.astype(compute_dtype).T, ((0, pad), (0, 0)))  # (hidden_pad, dim)
    return w13, w2p


def _weight_block_spec(block_shape, index_map, buffers):
    """Weight BlockSpec with deeper pipelining where requested / supported."""
    if buffers and buffers > 2:
        try:
            return pl.BlockSpec(block_shape, index_map,
                                pipeline_mode=pl.Buffered(buffers))
        except TypeError:
            pass
    return pl.BlockSpec(block_shape, index_map)


# --------------------------------------------------------------------------- #
# Kernel
# --------------------------------------------------------------------------- #
def _ffn_kernel(x_ref, w13_ref, w2_ref, o_ref, acc_ref, *, tn_h):
    # x_ref:   (tm, dim)        token tile (compute dtype), resident across h
    # w13_ref: (dim, 2*tn_h)    fused [W1 | W3] hidden slice, math layout
    # w2_ref:  (tn_h, dim)      W2^T hidden slice, math layout
    # o_ref:   (tm, dim)        output tile, resident across the hidden axis
    # acc_ref: (tm, dim) f32    scratch accumulator
    h = pl.program_id(1)

    @pl.when(h == 0)
    def _():
        acc_ref[...] = jnp.zeros_like(acc_ref)

    # Single fused gate-up matmul: (tm, dim) x (dim, 2*tn_h) -> (tm, 2*tn_h), f32 acc.
    h13 = jnp.dot(x_ref[...], w13_ref[...], preferred_element_type=jnp.float32)
    h1 = h13[:, :tn_h]
    h3 = h13[:, tn_h:]
    # SiLU gate in f32 (sigmoid on the EUP), then back to the MXU input dtype.
    gated = (h1 * jax.nn.sigmoid(h1) * h3).astype(w2_ref.dtype)
    # Down projection partial sum: (tm, tn_h) x (tn_h, dim) -> (tm, dim).
    acc_ref[...] += jnp.dot(gated, w2_ref[...], preferred_element_type=jnp.float32)

    @pl.when(h == pl.num_programs(1) - 1)
    def _():
        o_ref[...] = acc_ref[...].astype(o_ref.dtype)


# --------------------------------------------------------------------------- #
# Per-call implementation (weights already prepared)
# --------------------------------------------------------------------------- #
def _feed_forward(x, w13, w2p, *, tn_h, hidden_pad, tm_target, compute_dtype,
                  vmem_limit, weight_buffers, split_m_for_cores):
    orig_shape = x.shape
    dim = orig_shape[-1]
    M = math.prod(orig_shape[:-1])
    out_dtype = x.dtype

    bpe = jnp.dtype(compute_dtype).itemsize
    obpe = jnp.dtype(out_dtype).itemsize
    sub = 16 if bpe == 2 else 8                       # sublane alignment for tm

    tm = int(min(tm_target, _round_up(M, sub)))
    tm = _round_up(tm, sub)
    if split_m_for_cores and M >= 2 * sub and pl.cdiv(M, tm) < 2:
        # v7x-like chips: 2 TensorCores shard the "parallel" axis -> keep >=2 M blocks.
        tm = _round_up(pl.cdiv(M, 2), sub)
    n_m = pl.cdiv(M, tm)                              # ragged last tile handled by Pallas
    n_h = hidden_pad // tn_h

    x2d = x.reshape(M, dim)
    if x2d.dtype != compute_dtype:
        x2d = x2d.astype(compute_dtype)

    # Weights are re-fetched once per M tile with this grid order.
    cost = pl.CostEstimate(
        flops=6 * M * dim * hidden_pad,
        transcendentals=M * hidden_pad,
        bytes_accessed=M * dim * (bpe + obpe)
                       + n_m * (w13.size + w2p.size) * bpe,
    )

    kernel = functools.partial(_ffn_kernel, tn_h=tn_h)

    out2d = pl.pallas_call(
        kernel,
        out_shape=jax.ShapeDtypeStruct((M, dim), out_dtype),
        grid_spec=pltpu.PrefetchScalarGridSpec(
            num_scalar_prefetch=0,
            grid=(n_m, n_h),
            in_specs=[
                pl.BlockSpec((tm, dim), lambda i, h: (i, 0)),                  # x tile
                _weight_block_spec((dim, 2 * tn_h), lambda i, h: (0, h),
                                   weight_buffers),                            # fused W1|W3
                _weight_block_spec((tn_h, dim), lambda i, h: (h, 0),
                                   weight_buffers),                            # W2^T
            ],
            out_specs=pl.BlockSpec((tm, dim), lambda i, h: (i, 0)),
            scratch_shapes=[pltpu.VMEM((tm, dim), jnp.float32)],
        ),
        compiler_params=pltpu.CompilerParams(
            dimension_semantics=("parallel", "arbitrary"),
            vmem_limit_bytes=int(vmem_limit),
        ),
        cost_estimate=cost,
    )(x2d, w13, w2p)

    return out2d.reshape(orig_shape)


# --------------------------------------------------------------------------- #
# Public entry point: one-time weight prep + chip-aware planning
# --------------------------------------------------------------------------- #
def make_feed_forward(w1, w2, w3, *, compute_dtype=jnp.bfloat16, tm_target=512,
                      vmem_fraction=0.80):
    """Returns a callable x -> SwiGLU FFN(x) with weights prepared once.

    w1, w3: (hidden, dim) PyTorch layouts; w2: (dim, hidden).
    """
    hidden, dim = w1.shape
    assert w3.shape == (hidden, dim) and w2.shape == (dim, hidden)

    vmem_cap = _vmem_capacity_bytes()
    vmem_budget = int(vmem_cap * vmem_fraction)       # headroom: ~51 MiB on 64 MiB
    weight_buffers = 3 if vmem_cap >= (128 << 20) else 2   # deeper weight pipe on v5e/v6e
    split_m_for_cores = vmem_cap <= (64 << 20)        # heuristic for 2-TC (v7x-like) chips

    tn_h = _plan_tn_h(dim, hidden, tm=tm_target, compute_dtype=compute_dtype,
                      out_bytes=4, vmem_budget=vmem_budget,
                      weight_buffers=weight_buffers)
    hidden_pad = _round_up(hidden, tn_h)

    w13, w2p = _prepare_weights(w1, w2, w3, tn_h=tn_h, hidden_pad=hidden_pad,
                                compute_dtype=compute_dtype)

    impl = jax.jit(functools.partial(
        _feed_forward, tn_h=tn_h, hidden_pad=hidden_pad, tm_target=tm_target,
        compute_dtype=compute_dtype, vmem_limit=vmem_budget,
        weight_buffers=weight_buffers, split_m_for_cores=split_m_for_cores))

    return lambda x: impl(x, w13, w2p)


# --------------------------------------------------------------------------- #
# Reference + self-test
# --------------------------------------------------------------------------- #
def _reference(x, w1, w2, w3):
    h1 = jnp.einsum("bsd,hd->bsh", x, w1)
    h3 = jnp.einsum("bsd,hd->bsh", x, w3)
    g = (h1 * jax.nn.sigmoid(h1)) * h3
    return jnp.einsum("bsh,dh->bsd", g, w2)


if __name__ == "__main__":
    # Module hyperparameters (small but TPU-tile friendly).
    dim = 128
    hidden_dim_arg = 4 * dim          # llama convention: 4*dim passed in
    multiple_of = 128
    ffn_dim_multiplier = None
    hidden = _llama3_hidden_dim(dim, hidden_dim_arg, multiple_of,
                                ffn_dim_multiplier)   # -> 384

    batch, seq = 2, 8

    key = jax.random.PRNGKey(0)
    kx, k1, k2, k3 = jax.random.split(key, 4)
    x = jax.random.normal(kx, (batch, seq, dim), dtype=jnp.float32)
    # nn.Linear-style uniform init; weight shapes match PyTorch exactly.
    w1 = jax.random.uniform(k1, (hidden, dim), jnp.float32,
                            -1.0 / dim ** 0.5, 1.0 / dim ** 0.5)
    w3 = jax.random.uniform(k3, (hidden, dim), jnp.float32,
                            -1.0 / dim ** 0.5, 1.0 / dim ** 0.5)
    w2 = jax.random.uniform(k2, (dim, hidden), jnp.float32,
                            -1.0 / hidden ** 0.5, 1.0 / hidden ** 0.5)

    ffn = make_feed_forward(w1, w2, w3)               # one-time prep + planning
    out = jax.block_until_ready(ffn(x))

    ref = _reference(x, w1, w2, w3)
    assert out.shape == (batch, seq, dim)
    # bf16 matmuls with f32 accumulation vs a pure-f32 reference.
    err = float(jnp.max(jnp.abs(out - ref)))
    assert jnp.allclose(out, ref, atol=3e-2, rtol=3e-2), \
        f"mismatch vs reference, max abs err = {err}"

    print("KERNEL_OK")
</pallas_src>

<mosaic_0001>
module attributes {stable_mosaic.version = 11 : i64} {
  func.func @_ffn_kernel(%arg0: i32, %arg1: i32, %arg2: memref<16x128xbf16, #tpu.memory_space<vmem>>, %arg3: memref<128x768xbf16, #tpu.memory_space<vmem>>, %arg4: memref<384x128xbf16, #tpu.memory_space<vmem>>, %arg5: memref<16x128xf32, #tpu.memory_space<vmem>>, %arg6: memref<16x128xf32, #tpu.memory_space<vmem>>) attributes {dimension_semantics = [#tpu.dimension_semantics<parallel>, #tpu.dimension_semantics<arbitrary>], iteration_bounds = array<i64: 1, 1>, scalar_prefetch = 0 : i64, scratch_operands = 1 : i64, tpu.core_type = #tpu.core_type<tc>, window_params = [{transform_indices = @transform_0, window_bounds = array<i64: 16, 128>}, {transform_indices = @transform_1, window_bounds = array<i64: 128, 768>}, {transform_indices = @transform_2, window_bounds = array<i64: 384, 128>}, {transform_indices = @transform_3, window_bounds = array<i64: 16, 128>}]} {
    %c0_i32 = arith.constant 0 : i32
    %0 = arith.cmpi eq, %arg1, %c0_i32 : i32
    %1 = arith.extui %0 : i1 to i32
    %c0_i32_0 = arith.constant 0 : i32
    %2 = arith.cmpi ne, %1, %c0_i32_0 : i32
    scf.if %2 {
      %cst_14 = arith.constant 0.000000e+00 : f32
      %24 = vector.broadcast %cst_14 : f32 to vector<16x128xf32>
      %c0_15 = arith.constant 0 : index
      %c0_16 = arith.constant 0 : index
      %25 = vector.load %arg6[%c0_15, %c0_16] : memref<16x128xf32, #tpu.memory_space<vmem>>, vector<16x128xf32>
      tpu.vector_store %arg6[%c0_15, %c0_16], %24 {strides = array<i32>} : memref<16x128xf32, #tpu.memory_space<vmem>>, vector<16x128xf32>,
    } else {
    }
    %c0 = arith.constant 0 : index
    %c0_1 = arith.constant 0 : index
    %3 = vector.load %arg2[%c0, %c0_1] : memref<16x128xbf16, #tpu.memory_space<vmem>>, vector<16x128xbf16>
    %c0_2 = arith.constant 0 : index
    %c0_3 = arith.constant 0 : index
    %4 = vector.load %arg3[%c0_2, %c0_3] : memref<128x768xbf16, #tpu.memory_space<vmem>>, vector<128x768xbf16>
    %cst = arith.constant dense<0.000000e+00> : vector<16x768xf32>
    %5 = tpu.matmul %3, %4, %cst {dimension_numbers = #tpu.dot_dimension_numbers<[1], [0], [0], [1], [0, 0, 1, 1], [], []>} : vector<16x128xbf16>, vector<128x768xbf16>, vector<16x768xf32> -> vector<16x768xf32>
    %6 = vector.extract_strided_slice %5 {offsets = [0, 0], sizes = [16, 384], strides = [1, 1]} : vector<16x768xf32> to vector<16x384xf32>
    %7 = vector.extract_strided_slice %5 {offsets = [0, 384], sizes = [16, 384], strides = [1, 1]} : vector<16x768xf32> to vector<16x384xf32>
    %8 = arith.negf %6 : vector<16x384xf32>
    %9 = math.exp %8 : vector<16x384xf32>
    %cst_4 = arith.constant 1.000000e+00 : f32
    %10 = vector.broadcast %cst_4 : f32 to vector<16x384xf32>
    %11 = arith.addf %10, %9 : vector<16x384xf32>
    %12 = arith.divf %10, %11 : vector<16x384xf32>
    %13 = arith.mulf %6, %12 : vector<16x384xf32>
    %14 = arith.mulf %13, %7 : vector<16x384xf32>
    %15 = arith.truncf %14 : vector<16x384xf32> to vector<16x384xbf16>
    %c0_5 = arith.constant 0 : index
    %c0_6 = arith.constant 0 : index
    %16 = vector.load %arg6[%c0_5, %c0_6] : memref<16x128xf32, #tpu.memory_space<vmem>>, vector<16x128xf32>
    %c0_7 = arith.constant 0 : index
    %c0_8 = arith.constant 0 : index
    %17 = vector.load %arg4[%c0_7, %c0_8] : memref<384x128xbf16, #tpu.memory_space<vmem>>, vector<384x128xbf16>
    %cst_9 = arith.constant dense<0.000000e+00> : vector<16x128xf32>
    %18 = tpu.matmul %15, %17, %cst_9 {dimension_numbers = #tpu.dot_dimension_numbers<[1], [0], [0], [1], [0, 0, 1, 1], [], []>} : vector<16x384xbf16>, vector<384x128xbf16>, vector<16x128xf32> -> vector<16x128xf32>
    %19 = arith.addf %16, %18 : vector<16x128xf32>
    %c0_10 = arith.constant 0 : index
    %c0_11 = arith.constant 0 : index
    %20 = vector.load %arg6[%c0_10, %c0_11] : memref<16x128xf32, #tpu.memory_space<vmem>>, vector<16x128xf32>
    tpu.vector_store %arg6[%c0_10, %c0_11], %19 {strides = array<i32>} : memref<16x128xf32, #tpu.memory_space<vmem>>, vector<16x128xf32>,
    %c0_i32_12 = arith.constant 0 : i32
    %21 = arith.cmpi eq, %arg1, %c0_i32_12 : i32
    %22 = arith.extui %21 : i1 to i32
    %c0_i32_13 = arith.constant 0 : i32
    %23 = arith.cmpi ne, %22, %c0_i32_13 : i32
    scf.if %23 {
      %c0_14 = arith.constant 0 : index
      %c0_15 = arith.constant 0 : index
      %24 = vector.load %arg6[%c0_14, %c0_15] : memref<16x128xf32, #tpu.memory_space<vmem>>, vector<16x128xf32>
      %c0_16 = arith.constant 0 : index
      %c0_17 = arith.constant 0 : index
      %25 = vector.load %arg5[%c0_16, %c0_17] : memref<16x128xf32, #tpu.memory_space<vmem>>, vector<16x128xf32>
      tpu.vector_store %arg5[%c0_16, %c0_17], %24 {strides = array<i32>} : memref<16x128xf32, #tpu.memory_space<vmem>>, vector<16x128xf32>,
    } else {
    }
    return
  }
  func.func @transform_0(%arg0: i32, %arg1: i32) -> (i32, i32) {
    %c0_i32 = arith.constant 0 : i32
    %c0_i32_0 = arith.constant 0 : i32
    return %arg0, %c0_i32 : i32, i32
  }
  func.func @transform_1(%arg0: i32, %arg1: i32) -> (i32, i32) {
    %c0_i32 = arith.constant 0 : i32
    %c0_i32_0 = arith.constant 0 : i32
    return %c0_i32, %arg1 : i32, i32
  }
  func.func @transform_2(%arg0: i32, %arg1: i32) -> (i32, i32) {
    %c0_i32 = arith.constant 0 : i32
    %c0_i32_0 = arith.constant 0 : i32
    return %arg1, %c0_i32 : i32, i32
  }
  func.func @transform_3(%arg0: i32, %arg1: i32) -> (i32, i32) {
    %c0_i32 = arith.constant 0 : i32
    %c0_i32_0 = arith.constant 0 : i32
    return %arg0, %c0_i32 : i32, i32
  }
}

</mosaic_0001>

<bundles_post_ra>
// kernel: _feed_forward.1
= control target key start
LH: loop header
LB: loop body
LE: loop exit
PB: predicated region body
PF: predicated region fallthrough
CT: control target
= control target key end

     0   :  { %8 = vsyncpa [#allocation4], 0  ;;  %s1207_s0 = inlined_call_operand.vmem [shape: bf16[16,128], index: 0, kind: input, shape index: {}]   ;;  %s1208_s1 = inlined_call_operand.hbm [shape: bf16[128,768], index: 1, kind: input, shape index: {}]   ;;  %s1209_s2 = inlined_call_operand.hbm [shape: bf16[384,128], index: 2, kind: input, shape index: {}]   ;;  %s1210_s3 = inlined_call_operand.hbm [shape: f32[16,128], index: 3, kind: output, shape index: {}]  }
   0x1   :  { %9 = vsyncpa [#allocation7], 0 }
   0x2   :  { %10 = vsyncpa [#allocation5], 0  ;;  %s1160_s12 = smov [#allocation3]  }
   0x3   :  { %s18_s13 = sshll.u32 %s1160_s12, 4  ;;  %s19_s13 = int_to_ptr.vmem [resolvable:$true] %s18_s13 }
   0x4   :  { %s1102_s14 = scalar_lea.vmem %s19_s13, 6144  ;;  %p1107_p1 = scmp.lt.s32.totalorder %s19_s13, %s19_s13 }
   0x5   :  { %p1103_p0 = scmp.ne.s32.totalorder %s19_s13, %s1102_s14  ;;  %p1108_p2 = scmp.lt.s32.totalorder %s1102_s14, %s1102_s14 }
   0x7   :  { %p1109_p3 = por %p1108_p2, %p1107_p1 }
   0x9   :  { %p1110_p4 = pnand %p1109_p3, %p1103_p0 }
   0xb   :  { %1113 = shalt.err (!%p1110_p4)
}
   0xc   :  { %s1161_s15 = smov 384   ;;  %s1162_s16 = smov 24  }
   0xd   :  { %24 = dma.hbm_to_vmem [thread:$0]  %s1208_s1, 6144, %s19_s13, [#allocation4], %s1161_s15, %s1161_s15, %s1162_s16  }
   0xe   :  { %s1163_s19 = smov [#allocation6]  }
   0xf   :  { %s30_s20 = sshll.u32 %s1163_s19, 4  ;;  %s31_s20 = int_to_ptr.vmem [resolvable:$true] %s30_s20 }
  0x10   :  { %s1122_s21 = scalar_lea.vmem %s31_s20, 3072  ;;  %p1127_p6 = scmp.lt.s32.totalorder %s31_s20, %s31_s20 }
  0x11   :  { %p1123_p5 = scmp.ne.s32.totalorder %s31_s20, %s1122_s21  ;;  %p1128_p7 = scmp.lt.s32.totalorder %s1122_s21, %s1122_s21 }
  0x13   :  { %p1129_p8 = por %p1128_p7, %p1127_p6 }
  0x15   :  { %p1130_p9 = pnand %p1129_p8, %p1123_p5 }
  0x17   :  { %1133 = shalt.err (!%p1130_p9)
}
  0x18   :  { %s1164_s22 = smov 64   ;;  %s1165_s23 = smov 4  }
  0x19   :  { %36 = dma.hbm_to_vmem [thread:$0]  %s1209_s2, 3072, %s31_s20, [#allocation7], %s1164_s22, %s1164_s22, %s1165_s23  }
  0x1a   :  { %1154 = dma.done.wait [#allocation4], 6144  }
  0x1b   :  { %1155 = vsyncadd [#allocation4], 4294961152 }
  0x1c   :  { %1156 = dma.done.wait [#allocation7], 3072  }
  0x1d   :  { %1157 = vsyncadd [#allocation7], 4294964224  ;;  %v1166_v0 = vmov 0   ;;  %v973_v1 = vld [vmem:[#allocation3 + $0x154] ss:$24 sps:$4 sm:$0xff]   ;;  %v1021_v34 = vld [vmem:[%s1207_s0] sm:$0xff]  }
  0x1e   :  { %378 = vmatprep.mubr.bf16.mxu0 %v1166_v0  ;;  %421 = vmatprep.mubr.bf16.mxu1 %v1166_v0  ;;  %v975_v2 = vld [vmem:[#allocation3 + $0x15c] ss:$24 sps:$4 sm:$0xff]   ;;  %v977_v3 = vld [vmem:[#allocation3 + $0x150] ss:$24 sps:$4 sm:$0xff]   ;;  %v981_v6 = vld [vmem:[#allocation3 + $0x12c] ss:$24 sps:$4 sm:$0xff]  }
  0x1f   :  { %346 = vmatprep.subr.bf16.mxu0 %v973_v1  ;;  %v978_v4 = vld [vmem:[#allocation3 + $0x158] ss:$24 sps:$4 sm:$0xff]   ;;  %389 = vmatprep.subr.bf16.mxu1 %v975_v2  ;;  %v979_v5 = vld [vmem:[#allocation3 + $0x124] ss:$24 sps:$4 sm:$0xff]   ;;  %v984_v8 = vld [vmem:[#allocation3 + $0x128] ss:$24 sps:$4 sm:$0xff]  }
  0x20   :  { %347 = vmatpush1.bf16.msra.mxu0 %v977_v3  ;;  %390 = vmatpush1.bf16.msra.mxu1 %v978_v4  ;;  %v983_v7 = vld [vmem:[#allocation3 + $0x120] ss:$24 sps:$4 sm:$0xff]   ;;  %v985_v9 = vld [vmem:[#allocation3 + $0xf4] ss:$24 sps:$4 sm:$0xff]   ;;  %v989_v11 = vld [vmem:[#allocation3 + $0xf0] ss:$24 sps:$4 sm:$0xff]  }
  0x21   :  { %348 = vmatprep.subr.bf16.mxu0 %v979_v5  ;;  %391 = vmatprep.subr.bf16.mxu1 %v981_v6  ;;  %v987_v10 = vld [vmem:[#allocation3 + $0xfc] ss:$24 sps:$4 sm:$0xff]   ;;  %v990_v12 = vld [vmem:[#allocation3 + $0xf8] ss:$24 sps:$4 sm:$0xff]   ;;  %v993_v14 = vld [vmem:[#allocation3 + $0xcc] ss:$24 sps:$4 sm:$0xff]  }
  0x22   :  { %v991_v13 = vld [vmem:[#allocation3 + $0xc4] ss:$24 sps:$4 sm:$0xff]   ;;  %v995_v15 = vld [vmem:[#allocation3 + $0xc0] ss:$24 sps:$4 sm:$0xff]   ;;  %v997_v17 = vld [vmem:[#allocation3 + $0x94] ss:$24 sps:$4 sm:$0xff]  }
  0x23   :  { %v996_v16 = vld [vmem:[#allocation3 + $0xc8] ss:$24 sps:$4 sm:$0xff]   ;;  %v999_v18 = vld [vmem:[#allocation3 + $0x9c] ss:$24 sps:$4 sm:$0xff]   ;;  %v1002_v20 = vld [vmem:[#allocation3 + $0x98] ss:$24 sps:$4 sm:$0xff]  }
  0x24   :  { %349 = vmatpush1.bf16.msra.mxu0 %v983_v7  ;;  %392 = vmatpush1.bf16.msra.mxu1 %v984_v8  ;;  %v1001_v19 = vld [vmem:[#allocation3 + $0x90] ss:$24 sps:$4 sm:$0xff]   ;;  %v1003_v21 = vld [vmem:[#allocation3 + $0x64] ss:$24 sps:$4 sm:$0xff]   ;;  %v1007_v23 = vld [vmem:[#allocation3 + $0x60] ss:$24 sps:$4 sm:$0xff]  }
  0x25   :  { %350 = vmatprep.subr.bf16.mxu0 %v985_v9  ;;  %393 = vmatprep.subr.bf16.mxu1 %v987_v10  ;;  %v1005_v22 = vld [vmem:[#allocation3 + $0x6c] ss:$24 sps:$4 sm:$0xff]   ;;  %v1008_v24 = vld [vmem:[#allocation3 + $0x68] ss:$24 sps:$4 sm:$0xff]   ;;  %v1011_v26 = vld [vmem:[#allocation3 + $0x3c] ss:$24 sps:$4 sm:$0xff]  }
  0x26   :  { %v1009_v25 = vld [vmem:[#allocation3 + $0x34] ss:$24 sps:$4 sm:$0xff]   ;;  %v1013_v27 = vld [vmem:[#allocation3 + $0x30] ss:$24 sps:$4 sm:$0xff]   ;;  %v1015_v29 = vld [vmem:[#allocation3 + $0x4] ss:$24 sps:$4 sm:$0xff]  }
  0x27   :  { %v1014_v28 = vld [vmem:[#allocation3 + $0x38] ss:$24 sps:$4 sm:$0xff]   ;;  %v1017_v30 = vld [vmem:[#allocation3 + $0xc] ss:$24 sps:$4 sm:$0xff]   ;;  %v1020_v32 = vld [vmem:[#allocation3 + $0x8] ss:$24 sps:$4 sm:$0xff]  }
  0x28   :  { %351 = vmatpush1.bf16.msra.mxu0 %v989_v11  ;;  %394 = vmatpush1.bf16.msra.mxu1 %v990_v12  ;;  %v1019_v31 = vld [vmem:[#allocation3] ss:$24 sps:$4 sm:$0xff]   ;;  %v1024_v33 = vld [vmem:[#allocation3 + $0x164] ss:$24 sps:$4 sm:$0xff]   ;;  %v1027_v36 = vld [vmem:[#allocation3 + $0x134] ss:$24 sps:$4 sm:$0xff]  }
  0x29   :  { %352 = vmatprep.subr.bf16.mxu0 %v991_v13  ;;  %395 = vmatprep.subr.bf16.mxu1 %v993_v14  ;;  %v1022_v35 = vld [vmem:[#allocation3 + $0x160] ss:$24 sps:$4 sm:$0xff]   ;;  %v1025_v37 = vld [vmem:[#allocation3 + $0x130] ss:$24 sps:$4 sm:$0xff]   ;;  %v1030_v38 = vld [vmem:[#allocation3 + $0x104] ss:$24 sps:$4 sm:$0xff]  }
  0x2a   :  { %v1028_v39 = vld [vmem:[#allocation3 + $0x100] ss:$24 sps:$4 sm:$0xff]   ;;  %v1033_v40 = vld [vmem:[#allocation3 + $0xd4] ss:$24 sps:$4 sm:$0xff]   ;;  %v1031_v41 = vld [vmem:[#allocation3 + $0xd0] ss:$24 sps:$4 sm:$0xff]  }
  0x2b   :  { %v1036_v42 = vld [vmem:[#allocation3 + $0xa4] ss:$24 sps:$4 sm:$0xff]   ;;  %v1034_v43 = vld [vmem:[#allocation3 + $0xa0] ss:$24 sps:$4 sm:$0xff]   ;;  %v1039_v44 = vld [vmem:[#allocation3 + $0x74] ss:$24 sps:$4 sm:$0xff]  }
  0x2c   :  { %353 = vmatpush1.bf16.msra.mxu0 %v995_v15  ;;  %396 = vmatpush1.bf16.msra.mxu1 %v996_v16  ;;  %v1037_v45 = vld [vmem:[#allocation3 + $0x70] ss:$24 sps:$4 sm:$0xff]   ;;  %v1042_v46 = vld [vmem:[#allocation3 + $0x44] ss:$24 sps:$4 sm:$0xff]   ;;  %v1040_v47 = vld [vmem:[#allocation3 + $0x40] ss:$24 sps:$4 sm:$0xff]  }
  0x2d   :  { %354 = vmatprep.subr.bf16.mxu0 %v997_v17  ;;  %397 = vmatprep.subr.bf16.mxu1 %v999_v18  ;;  %v1045_v48 = vld [vmem:[#allocation3 + $0x14] ss:$24 sps:$4 sm:$0xff]   ;;  %v1043_v49 = vld [vmem:[#allocation3 + $0x10] ss:$24 sps:$4 sm:$0xff]   ;;  %v1046_v50 = vld [vmem:[#allocation6 + $0xb8] sm:$0xff]   ;;  %v1167_v51 = vmov 0.0  }
  0x2e   :  { %v1047_v52 = vld [vmem:[#allocation6 + $0x78] sm:$0xff]   ;;  %v1049_v54 = vld [vmem:[#allocation6 + $0xb0] sm:$0xff]   ;;  %v1052_v57 = vld [vmem:[#allocation6 + $0xa8] sm:$0xff]   ;;  %vm1168_vm0 = vmmov 0   ;;  %s1169_s0 = smov [#allocation8]  }
  0x2f   :  { %v1048_v53 = vld [vmem:[#allocation6 + $0x38] sm:$0xff]   ;;  %v1050_v55 = vld [vmem:[#allocation6 + $0x70] sm:$0xff]   ;;  %v1053_v58 = vld [vmem:[#allocation6 + $0x68] sm:$0xff]   ;;  %s818_s26 = sshll.u32 %s1169_s0, 4  ;;  %s819_s26 = int_to_ptr.vmem [resolvable:$true] %s818_s26 }
  0x30   :  { %355 = vmatpush1.bf16.msra.mxu0 %v1001_v19  ;;  %398 = vmatpush1.bf16.msra.mxu1 %v1002_v20  ;;  %v1051_v56 = vld [vmem:[#allocation6 + $0x30] sm:$0xff]   ;;  %v1054_v59 = vld [vmem:[#allocation6 + $0x28] sm:$0xff]   ;;  %v1055_v60 = vld [vmem:[#allocation6 + $0xa0] sm:$0xff]   ;;  %s1134_s27 = scalar_lea.vmem %s819_s26, 256  ;;  %p1139_p11 = scmp.lt.s32.totalorder %s819_s26, %s819_s26 }
  0x31   :  { %356 = vmatprep.subr.bf16.mxu0 %v1003_v21  ;;  %399 = vmatprep.subr.bf16.mxu1 %v1005_v22  ;;  %v1056_v61 = vld [vmem:[#allocation6 + $0x60] sm:$0xff]   ;;  %v1058_v63 = vld [vmem:[#allocation6 + $0x98] sm:$0xff]   ;;  %v1061_v2 = vld [vmem:[#allocation6 + $0x90] sm:$0xff]   ;;  %p1135_p10 = scmp.ne.s32.totalorder %s819_s26, %s1134_s27  ;;  %p1140_p12 = scmp.lt.s32.totalorder %s1134_s27, %s1134_s27 }
  0x32   :  { %v1057_v62 = vld [vmem:[#allocation6 + $0x20] sm:$0xff]   ;;  %v1060_v1 = vld [vmem:[#allocation6 + $0x18] sm:$0xff]   ;;  %v1062_v3 = vld [vmem:[#allocation6 + $0x50] sm:$0xff]  }
  0x33   :  { %v1063_v4 = vld [vmem:[#allocation6 + $0x10] sm:$0xff]   ;;  %v1064_v5 = vld [vmem:[#allocation6 + $0x88] sm:$0xff]   ;;  %v1067_v8 = vld [vmem:[#allocation6 + $0x80] sm:$0xff]   ;;  %p1141_p13 = por %p1140_p12, %p1139_p11 }
  0x34   :  { %357 = vmatpush1.bf16.msra.mxu0 %v1007_v23  ;;  %400 = vmatpush1.bf16.msra.mxu1 %v1008_v24  ;;  %v1065_v6 = vld [vmem:[#allocation6 + $0x48] sm:$0xff]   ;;  %v1068_v9 = vld [vmem:[#allocation6 + $0x40] sm:$0xff]  }
  0x35   :  { %358 = vmatprep.subr.bf16.mxu0 %v1009_v25  ;;  %401 = vmatprep.subr.bf16.mxu1 %v1011_v26  ;;  %v1066_v7 = vld [vmem:[#allocation6 + $0x8] sm:$0xff]   ;;  %v1069_v10 = vld [vmem:[#allocation6] sm:$0xff]   ;;  %p1142_p0 = pnand %p1141_p13, %p1135_p10 }
  0x38   :  { %359 = vmatpush1.bf16.msra.mxu0 %v1013_v27  ;;  %402 = vmatpush1.bf16.msra.mxu1 %v1014_v28 }
  0x39   :  { %360 = vmatprep.subr.bf16.mxu0 %v1015_v29  ;;  %403 = vmatprep.subr.bf16.mxu1 %v1017_v30 }
  0x3c   :  { %361 = vmatpush1.bf16.msra.mxu0 %v1019_v31  ;;  %404 = vmatpush1.bf16.msra.mxu1 %v1020_v32 }
  0x3d   :  { %432 = vmatprep.subr.bf16.mxu0 %v1024_v33  ;;  %910 = vmatprep.subr.bf16.mxu1 %v1047_v52 }
  0x3f   :  { %379 = vmatmul.mubr.bf16.vlgmr.msra.gmra.mxu0 %v1021_v34  ;;  %422 = vmatmul.mubr.bf16.vlgmr.msra.gmra.mxu1 %v1021_v34 }
  0x40   :  { %433 = vmatpush1.bf16.msra.mxu0 %v1022_v35  ;;  %464 = vmatprep.mubr.bf16.mxu0 %v1166_v0  ;;  %v1059_v0 = vld [vmem:[#allocation6 + $0x58] sm:$0xff]  }
  0x41   :  { %434 = vmatprep.subr.bf16.mxu0 %v1027_v36  ;;  %911 = vmatpush3.bf16.msra.mxu1 %v1048_v53 }
  0x42   :  { %912 = vmatprep.subr.bf16.mxu1 %v1050_v55 }
  0x44   :  { %435 = vmatpush1.bf16.msra.mxu0 %v1025_v37 }
  0x45   :  { %436 = vmatprep.subr.bf16.mxu0 %v1030_v38  ;;  %913 = vmatpush3.bf16.msra.mxu1 %v1051_v56 }
  0x46   :  { %914 = vmatprep.subr.bf16.mxu1 %v1053_v58 }
  0x48   :  { %437 = vmatpush1.bf16.msra.mxu0 %v1028_v39 }
  0x49   :  { %438 = vmatprep.subr.bf16.mxu0 %v1033_v40  ;;  %915 = vmatpush3.bf16.msra.mxu1 %v1054_v59 }
  0x4a   :  { %916 = vmatprep.subr.bf16.mxu1 %v1056_v61 }
  0x4c   :  { %439 = vmatpush1.bf16.msra.mxu0 %v1031_v41 }
  0x4d   :  { %440 = vmatprep.subr.bf16.mxu0 %v1036_v42  ;;  %917 = vmatpush3.bf16.msra.mxu1 %v1057_v62 }
  0x4e   :  { %918 = vmatprep.subr.bf16.mxu1 %v1059_v0 }
  0x50   :  { %441 = vmatpush1.bf16.msra.mxu0 %v1034_v43 }
  0x51   :  { %442 = vmatprep.subr.bf16.mxu0 %v1039_v44  ;;  %919 = vmatpush3.bf16.msra.mxu1 %v1060_v1 }
  0x52   :  { %920 = vmatprep.subr.bf16.mxu1 %v1062_v3 }
  0x54   :  { %443 = vmatpush1.bf16.msra.mxu0 %v1037_v45 }
  0x55   :  { %444 = vmatprep.subr.bf16.mxu0 %v1042_v46  ;;  %921 = vmatpush3.bf16.msra.mxu1 %v1063_v4 }
  0x56   :  { %922 = vmatprep.subr.bf16.mxu1 %v1065_v6 }
  0x58   :  { %445 = vmatpush1.bf16.msra.mxu0 %v1040_v47 }
  0x59   :  { %446 = vmatprep.subr.bf16.mxu0 %v1045_v48  ;;  %923 = vmatpush3.bf16.msra.mxu1 %v1066_v7 }
  0x5a   :  { %924 = vmatprep.subr.bf16.mxu1 %v1068_v9 }
  0x5c   :  { %447 = vmatpush1.bf16.msra.mxu0 %v1043_v49 }
  0x5d   :  { %941 = vmatprep.subr.bf16.mxu0 %v1167_v51  ;;  %925 = vmatpush3.bf16.msra.mxu1 %v1069_v10 }
  0x5f   :  { %465 = vmatmul.mubr.bf16.vlgmr.msra.gmra.mxu0 %v1021_v34 }
  0x60   :  { %942 = vmatpush3.bf16.msra.mxu0 %v1046_v50  ;;  %957 = vmatprep.mubr.msk.bf16.mxu0 %vm1168_vm0, %v1167_v51 }
  0x61   :  { %943 = vmatprep.subr.bf16.mxu0 %v1167_v51 }
  0x64   :  { %944 = vmatpush3.bf16.msra.mxu0 %v1049_v54 }
  0x65   :  { %945 = vmatprep.subr.bf16.mxu0 %v1167_v51 }
  0x68   :  { %946 = vmatpush3.bf16.msra.mxu0 %v1052_v57 }
  0x69   :  { %947 = vmatprep.subr.bf16.mxu0 %v1167_v51 }
  0x6c   :  { %948 = vmatpush3.bf16.msra.mxu0 %v1055_v60 }
  0x6d   :  { %949 = vmatprep.subr.bf16.mxu0 %v1167_v51 }
  0x70   :  { %950 = vmatpush3.bf16.msra.mxu0 %v1058_v63 }
  0x71   :  { %951 = vmatprep.subr.bf16.mxu0 %v1167_v51 }
  0x74   :  { %952 = vmatpush3.bf16.msra.mxu0 %v1061_v2 }
  0x75   :  { %953 = vmatprep.subr.bf16.mxu0 %v1167_v51 }
  0x78   :  { %954 = vmatpush3.bf16.msra.mxu0 %v1064_v5 }
  0x79   :  { %955 = vmatprep.subr.bf16.mxu0 %v1167_v51 }
  0x7c   :  { %956 = vmatpush3.bf16.msra.mxu0 %v1067_v8 }
  0xff   :  { %v380_v11 = vpop.f32.mrf.mxu0  ;;  %v423_v12 = vpop.f32.mrf.mxu1 }
 0x100   :  { %v880_v13 = vmul.f32 -1.442695, %v380_v11  ;;  %v882_v14 = vmul.f32 -1.442695, %v423_v12 }
 0x101   :  { %v382_v15 = vpop.f32.mrf.mxu0  ;;  %v425_v16 = vpop.f32.mrf.mxu1 }
 0x102   :  { %1070 = vpow2.f32 %v880_v13  ;;  %v881_v17 = vmul.f32 -1.442695, %v382_v15 }
 0x103   :  { %1072 = vpow2.f32 %v882_v14  ;;  %v384_v18 = vpop.f32.mrf.mxu0  ;;  %v427_v19 = vpop.f32.mrf.mxu1 }
 0x104   :  { %1074 = vpow2.f32 %v881_v17  ;;  %v883_v20 = vmul.f32 -1.442695, %v384_v18  ;;  %v885_v21 = vmul.f32 -1.442695, %v427_v19 }
 0x105   :  { %v386_v22 = vpop.f32.mrf.mxu0  ;;  %v429_v52 = vpop.f32.mrf.mxu1 }
 0x106   :  { %1076 = vpow2.f32 %v883_v20  ;;  %v884_v23 = vmul.f32 -1.442695, %v386_v22 }
 0x107   :  { %1078 = vpow2.f32 %v885_v21 }
 0x108   :  { %1080 = vpow2.f32 %v884_v23 }
 0x10f   :  { %v1071_v24 = vpop.eup %1070 }
 0x110   :  { %v1073_v25 = vpop.eup %1072  ;;  %v493_v27 = vadd.f32 1.0, %v1071_v24 }
 0x111   :  { %v1075_v26 = vpop.eup %1074  ;;  %v495_v28 = vadd.f32 1.0, %v1073_v25 }
 0x112   :  { %v494_v29 = vadd.f32 1.0, %v1075_v26 }
 0x113   :  { %v1077_v30 = vpop.eup %1076  ;;  %1082 = vrcp.f32 %v495_v28 }
 0x114   :  { %v1079_v31 = vpop.eup %1078  ;;  %1084 = vrcp.f32 %v494_v29  ;;  %v496_v32 = vadd.f32 1.0, %v1077_v30 }
 0x115   :  { %v1081_v33 = vpop.eup %1080  ;;  %1086 = vrcp.f32 %v493_v27  ;;  %v498_v34 = vadd.f32 1.0, %v1079_v31 }
 0x116   :  { %1088 = vrcp.f32 %v496_v32  ;;  %v497_v35 = vadd.f32 1.0, %v1081_v33 }
 0x117   :  { %1090 = vrcp.f32 %v498_v34 }
 0x118   :  { %1092 = vrcp.f32 %v497_v35 }
 0x11f   :  { %v466_v36 = vpop.f32.mrf.mxu0 }
 0x120   :  { %v1083_v37 = vpop.eup %1082 }
 0x121   :  { %v1085_v38 = vpop.eup %1084  ;;  %v468_v39 = vpop.f32.mrf.mxu0  ;;  %v513_v42 = vmul.f32 %v1083_v37, %v423_v12 }
 0x122   :  { %v1087_v40 = vpop.eup %1086  ;;  %v512_v45 = vmul.f32 %v1085_v38, %v382_v15 }
 0x123   :  { %v1089_v41 = vpop.eup %1088  ;;  %v470_v43 = vpop.f32.mrf.mxu0  ;;  %v511_v48 = vmul.f32 %v1087_v40, %v380_v11  ;;  %v519_v54 = vmul.f32 %v513_v42, %v468_v39 }
 0x124   :  { %v1091_v44 = vpop.eup %1090  ;;  %v514_v46 = vmul.f32 %v1089_v41, %v384_v18  ;;  %v518_v56 = vmul.f32 %v512_v45, %v466_v36 }
 0x125   :  { %v1093_v47 = vpop.eup %1092  ;;  %v516_v49 = vmul.f32 %v1091_v44, %v427_v19  ;;  %v472_v50 = vpop.f32.mrf.mxu0  ;;  %v517_v58 = vmul.f32 %v511_v48, %v425_v16 }
 0x126   :  { %v515_v51 = vmul.f32 %v1093_v47, %v386_v22  ;;  %v520_v53 = vmul.f32 %v514_v46, %v429_v52 }
 0x127   :  { %v522_v55 = vmul.f32 %v516_v49, %v472_v50 }
 0x128   :  { %v521_v57 = vmul.f32 %v515_v51, %v470_v43  ;;  %v523_v61 = vpack.c.bf16 %v520_v53, %v517_v58 }
 0x129   :  { %v525_v59 = vpack.c.bf16 %v522_v55, %v519_v54 }
 0x12a   :  { %v524_v60 = vpack.c.bf16 %v521_v57, %v518_v56 }
 0x12b   :  { %958 = vmatmul.mubr.bf16.vlgmr.msra.gmra.mxu0 %v525_v59 }
 0x12c   :  { %752 = vmatprep.mubr.bf16.mxu1 %v524_v60 }
 0x12d   :  { %753 = vmatmul.mubr.bf16.vlgmr.msra.gmra.mxu1 %v523_v61 }
 0x1eb   :  { %v795_v62 = vpop.f32.mrf.mxu0 }
 0x1ed   :  { %v959_v63 = vpop.f32.mrf.mxu0  ;;  %v926_v0 = vpop.f32.mrf.mxu1 }
 0x1ef   :  { %v798_v1 = vpop.f32.mrf.mxu0  ;;  %v927_v2 = vpop.f32.mrf.mxu1 }
 0x1f0   :  { %v928_v3 = vadd.f32 %v927_v2, %v926_v0 }
 0x1f1   :  { %v960_v4 = vpop.f32.mrf.mxu0  ;;  %v929_v5 = vpop.f32.mrf.mxu1 }
 0x1f2   :  { %v796_v6 = vadd.f32 %v928_v3, %v795_v62 }
 0x1f3   :  { %v930_v7 = vpop.f32.mrf.mxu1 }
 0x1f4   :  { %811 = vst [vmem:[#allocation8] sm:$0xff] %v796_v6  ;;  %v931_v8 = vadd.f32 %v930_v7, %v929_v5 }
 0x1f6   :  { %v799_v9 = vadd.f32 %v931_v8, %v798_v1 }
 0x1f8   :  { %812 = vst [vmem:[#allocation8 + $0x8] sm:$0xff] %v799_v9 }
 0x1f9   :  { %1145 = shalt.err (!%p1142_p0)
}
 0x1fa   :  { %s1170_s28 = smov 128   ;;  %s1171_s29 = smov 8  }
 0x1fb   :  { %824 = dma.vmem_to_hbm [thread:$0]  %s819_s26, 256, %s1210_s3, [#allocation5], %s1170_s28, %s1170_s28, %s1171_s29  }
 0x1fc   :  { %1158 = dma.done.wait [#allocation5], 256  }
 0x1fd   :  { %1159 = vsyncadd [#allocation5], 4294967040 }
 0x1fe   :  { %828 = vsyncpa [#allocation4], 1 }
 0x1ff   :  { %829 = vsyncpa [#allocation7], 1 }
 0x200   :  { %830 = vsyncpa [#allocation5], 1 }

</bundles_post_ra>
